<compile_context>
chip_gen: v6e
topology: v6e:2x2x1
jax: 0.10.0
libtpu: 0.0.40
codegen_flags: <defaults>
</compile_context>

<pallas_src>
import jax
import jax.numpy as jnp
from jax.experimental import pallas as pl
from jax.experimental.pallas import tpu as pltpu

DROPOUT_P = 0.1
LN_EPS = 1e-12
TILE_R = 256   # row tile (multiple of 8); sized so double-buffered tiles +
               # one resident (H,H) f32 weight fit v7x's 64 MiB VMEM at H=1024.


def fusion_kernel(x1_ref, x2_ref, mask_ref,        # (TR, H) row tiles
                  bias_ref, gamma_ref, beta_ref,   # (1, H)  resident
                  w_ref, b_ref,                    # (H, H), (1, H) summed, resident
                  o_ref):                          # (TR, H)
    # out1 = inputs1 + bias ; out2 = dropout(out1) ; out3 = out2 + inputs2
    out3 = (x1_ref[...] + bias_ref[...]) * mask_ref[...] + x2_ref[...]

    # out4 = LayerNorm(out3) over the hidden (last / lane) axis
    mean = jnp.mean(out3, axis=-1, keepdims=True)
    centered = out3 - mean
    var = jnp.mean(centered * centered, axis=-1, keepdims=True)
    out4 = centered * jax.lax.rsqrt(var + LN_EPS) * gamma_ref[...] + beta_ref[...]

    # out5 + out6 + out7 == out4 @ (Wa + Wb + Wc) + (ba + bb + bc)
    w = w_ref[...]
    acc = jnp.dot(out4.astype(w.dtype), w, preferred_element_type=jnp.float32)
    o_ref[...] = (acc + b_ref[...]).astype(o_ref.dtype)


def _dropout_mask(seed, shape):
    """Pre-scaled keep mask: keep/(1-p). Deterministic given `seed`."""
    keep = jax.random.bernoulli(jax.random.PRNGKey(seed), 1.0 - DROPOUT_P, shape)
    return keep.astype(jnp.float32) * (1.0 / (1.0 - DROPOUT_P))


def fusion_forward(inputs1, inputs2, params, seed=0, training=True,
                   bf16_matmul=False):
    """inputs1/inputs2: (B, S, H) float32 -> (B, S, H) float32."""
    B, S, H = inputs1.shape
    R = B * S
    x1 = inputs1.reshape(R, H)
    x2 = inputs2.reshape(R, H)

    if training:
        mask = _dropout_mask(seed, (R, H))
    else:
        mask = jnp.ones((R, H), jnp.float32)

    # Fold the three Linear layers into one summed weight / summed bias.
    w_sum = params["wa_t"] + params["wb_t"] + params["wc_t"]
    b_sum = (params["ba"] + params["bb"] + params["bc"]).reshape(1, H)
    if bf16_matmul:  # optional: ~3x MXU throughput on v6e/v7x (f32 accumulate)
        w_sum = w_sum.astype(jnp.bfloat16)

    # Row tiling; pad rows so the grid divides evenly (padded rows are zeros,
    # produce finite values and are sliced off afterwards).
    tile_r = R if R <= TILE_R else TILE_R
    r_pad = pl.cdiv(R, tile_r) * tile_r
    if r_pad != R:
        pad = ((0, r_pad - R), (0, 0))
        x1 = jnp.pad(x1, pad)
        x2 = jnp.pad(x2, pad)
        mask = jnp.pad(mask, pad)

    row_spec = pl.BlockSpec((tile_r, H), lambda i: (i, 0))
    vec_spec = pl.BlockSpec((1, H), lambda i: (0, 0))
    w_spec = pl.BlockSpec((H, H), lambda i: (0, 0))

    # VMEM budget: double-buffered row tiles + resident weight + LN params.
    itemsize = 4
    per_buf = (4 * tile_r * H + H * H + 4 * H) * itemsize
    vmem_limit = int(min(max(2 * per_buf + (2 << 20), 16 << 20), 64 << 20))

    out = pl.pallas_call(
        fusion_kernel,
        out_shape=jax.ShapeDtypeStruct((r_pad, H), jnp.float32),
        grid=(r_pad // tile_r,),
        in_specs=[row_spec, row_spec, row_spec,
                  vec_spec, vec_spec, vec_spec,
                  w_spec, vec_spec],
        out_specs=row_spec,
        compiler_params=pltpu.CompilerParams(
            dimension_semantics=("parallel",),
            vmem_limit_bytes=vmem_limit),
    )(x1, x2, mask,
      params["bias"].reshape(1, H),
      params["ln_gamma"].reshape(1, H),
      params["ln_beta"].reshape(1, H),
      w_sum, b_sum)

    return out[:R].reshape(B, S, H)


def init_params(key, hidden):
    ks = jax.random.split(key, 6)
    bound = 1.0 / jnp.sqrt(hidden)
    u = lambda k, shape: jax.random.uniform(k, shape, jnp.float32, -bound, bound)
    return {
        "bias": jnp.zeros((hidden,), jnp.float32),     # Parameter init: zeros
        "ln_gamma": jnp.ones((hidden,), jnp.float32),
        "ln_beta": jnp.zeros((hidden,), jnp.float32),
        # Linear weights stored pre-transposed: (in, out) so x @ W == x @ W_pt.T
        "wa_t": u(ks[0], (hidden, hidden)),
        "ba": u(ks[1], (hidden,)),
        "wb_t": u(ks[2], (hidden, hidden)),
        "bb": u(ks[3], (hidden,)),
        "wc_t": u(ks[4], (hidden, hidden)),
        "bc": u(ks[5], (hidden,)),
    }


def fusion_reference(inputs1, inputs2, params, mask):
    """Pure-JAX reference with the original three separate Linears."""
    out1 = inputs1 + params["bias"]
    out2 = out1 * mask
    out3 = out2 + inputs2
    mean = out3.mean(-1, keepdims=True)
    centered = out3 - mean
    var = (centered * centered).mean(-1, keepdims=True)
    out4 = centered * jax.lax.rsqrt(var + LN_EPS) * params["ln_gamma"] + params["ln_beta"]
    out5 = out4 @ params["wa_t"] + params["ba"]
    out6 = out4 @ params["wb_t"] + params["bb"]
    out7 = out4 @ params["wc_t"] + params["bc"]
    return out5 + out6 + out7


if __name__ == "__main__":
    B, S, H = 2, 8, 32   # NOTE: for performance, H should be a multiple of 128.
    key = jax.random.PRNGKey(0)
    k1, k2, kp = jax.random.split(key, 3)

    inputs1 = jax.random.normal(k1, (B, S, H), jnp.float32)
    inputs2 = jax.random.normal(k2, (B, S, H), jnp.float32)
    params = init_params(kp, H)

    out = fusion_forward(inputs1, inputs2, params, seed=0)
    jax.block_until_ready(out)
    assert out.shape == (B, S, H)

    mask = _dropout_mask(0, (B * S, H)).reshape(B, S, H)
    ref = fusion_reference(inputs1, inputs2, params, mask)
    assert jnp.allclose(out, ref, atol=2e-3, rtol=2e-3), \
        float(jnp.max(jnp.abs(out - ref)))
    print("KERNEL_OK")
</pallas_src>

<mosaic_0001>
module attributes {stable_mosaic.version = 11 : i64} {
  func.func @fusion_kernel(%arg0: i32, %arg1: memref<16x32xf32, #tpu.memory_space<vmem>>, %arg2: memref<16x32xf32, #tpu.memory_space<vmem>>, %arg3: memref<16x32xf32, #tpu.memory_space<vmem>>, %arg4: memref<1x32xf32, #tpu.memory_space<vmem>>, %arg5: memref<1x32xf32, #tpu.memory_space<vmem>>, %arg6: memref<1x32xf32, #tpu.memory_space<vmem>>, %arg7: memref<32x32xf32, #tpu.memory_space<vmem>>, %arg8: memref<1x32xf32, #tpu.memory_space<vmem>>, %arg9: memref<16x32xf32, #tpu.memory_space<vmem>>) attributes {dimension_semantics = [#tpu.dimension_semantics<parallel>], iteration_bounds = array<i64: 1>, scalar_prefetch = 0 : i64, scratch_operands = 0 : i64, tpu.core_type = #tpu.core_type<tc>, window_params = [{transform_indices = @transform_0, window_bounds = array<i64: 16, 32>}, {transform_indices = @transform_1, window_bounds = array<i64: 16, 32>}, {transform_indices = @transform_2, window_bounds = array<i64: 16, 32>}, {pipeline_mode = #tpu.pipeline_mode<synchronous>, transform_indices = @transform_3, window_bounds = array<i64: 1, 32>}, {pipeline_mode = #tpu.pipeline_mode<synchronous>, transform_indices = @transform_4, window_bounds = array<i64: 1, 32>}, {pipeline_mode = #tpu.pipeline_mode<synchronous>, transform_indices = @transform_5, window_bounds = array<i64: 1, 32>}, {pipeline_mode = #tpu.pipeline_mode<synchronous>, transform_indices = @transform_6, window_bounds = array<i64: 32, 32>}, {pipeline_mode = #tpu.pipeline_mode<synchronous>, transform_indices = @transform_7, window_bounds = array<i64: 1, 32>}, {transform_indices = @transform_8, window_bounds = array<i64: 16, 32>}]} {
    %c0 = arith.constant 0 : index
    %c0_0 = arith.constant 0 : index
    %0 = vector.load %arg1[%c0, %c0_0] : memref<16x32xf32, #tpu.memory_space<vmem>>, vector<16x32xf32>
    %c0_1 = arith.constant 0 : index
    %c0_2 = arith.constant 0 : index
    %1 = vector.load %arg4[%c0_1, %c0_2] : memref<1x32xf32, #tpu.memory_space<vmem>>, vector<1x32xf32>
    %2 = vector.broadcast %1 : vector<1x32xf32> to vector<16x32xf32>
    %3 = arith.addf %0, %2 : vector<16x32xf32>
    %c0_3 = arith.constant 0 : index
    %c0_4 = arith.constant 0 : index
    %4 = vector.load %arg3[%c0_3, %c0_4] : memref<16x32xf32, #tpu.memory_space<vmem>>, vector<16x32xf32>
    %5 = arith.mulf %3, %4 : vector<16x32xf32>
    %c0_5 = arith.constant 0 : index
    %c0_6 = arith.constant 0 : index
    %6 = vector.load %arg2[%c0_5, %c0_6] : memref<16x32xf32, #tpu.memory_space<vmem>>, vector<16x32xf32>
    %7 = arith.addf %5, %6 : vector<16x32xf32>
    %cst = arith.constant dense<0.000000e+00> : vector<16xf32>
    %8 = vector.multi_reduction <add>, %7, %cst [1] : vector<16x32xf32> to vector<16xf32>
    %9 = vector.shape_cast %8 : vector<16xf32> to vector<16x1xf32>
    %cst_7 = arith.constant 3.200000e+01 : f32
    %10 = vector.broadcast %cst_7 : f32 to vector<16x1xf32>
    %11 = arith.divf %9, %10 : vector<16x1xf32>
    %12 = vector.broadcast %11 : vector<16x1xf32> to vector<16x32xf32>
    %13 = arith.subf %7, %12 : vector<16x32xf32>
    %14 = arith.mulf %13, %13 : vector<16x32xf32>
    %cst_8 = arith.constant dense<0.000000e+00> : vector<16xf32>
    %15 = vector.multi_reduction <add>, %14, %cst_8 [1] : vector<16x32xf32> to vector<16xf32>
    %16 = vector.shape_cast %15 : vector<16xf32> to vector<16x1xf32>
    %cst_9 = arith.constant 3.200000e+01 : f32
    %17 = vector.broadcast %cst_9 : f32 to vector<16x1xf32>
    %18 = arith.divf %16, %17 : vector<16x1xf32>
    %cst_10 = arith.constant 9.99999996E-13 : f32
    %19 = vector.broadcast %cst_10 : f32 to vector<16x1xf32>
    %20 = arith.addf %18, %19 : vector<16x1xf32>
    %21 = math.rsqrt %20 : vector<16x1xf32>
    %22 = vector.broadcast %21 : vector<16x1xf32> to vector<16x32xf32>
    %23 = arith.mulf %13, %22 : vector<16x32xf32>
    %c0_11 = arith.constant 0 : index
    %c0_12 = arith.constant 0 : index
    %24 = vector.load %arg5[%c0_11, %c0_12] : memref<1x32xf32, #tpu.memory_space<vmem>>, vector<1x32xf32>
    %25 = vector.broadcast %24 : vector<1x32xf32> to vector<16x32xf32>
    %26 = arith.mulf %23, %25 : vector<16x32xf32>
    %c0_13 = arith.constant 0 : index
    %c0_14 = arith.constant 0 : index
    %27 = vector.load %arg6[%c0_13, %c0_14] : memref<1x32xf32, #tpu.memory_space<vmem>>, vector<1x32xf32>
    %28 = vector.broadcast %27 : vector<1x32xf32> to vector<16x32xf32>
    %29 = arith.addf %26, %28 : vector<16x32xf32>
    %c0_15 = arith.constant 0 : index
    %c0_16 = arith.constant 0 : index
    %30 = vector.load %arg7[%c0_15, %c0_16] : memref<32x32xf32, #tpu.memory_space<vmem>>, vector<32x32xf32>
    %cst_17 = arith.constant dense<0.000000e+00> : vector<16x32xf32>
    %31 = tpu.matmul %29, %30, %cst_17 {dimension_numbers = #tpu.dot_dimension_numbers<[1], [0], [0], [1], [0, 0, 1, 1], [], []>} : vector<16x32xf32>, vector<32x32xf32>, vector<16x32xf32> -> vector<16x32xf32>
    %c0_18 = arith.constant 0 : index
    %c0_19 = arith.constant 0 : index
    %32 = vector.load %arg8[%c0_18, %c0_19] : memref<1x32xf32, #tpu.memory_space<vmem>>, vector<1x32xf32>
    %33 = vector.broadcast %32 : vector<1x32xf32> to vector<16x32xf32>
    %34 = arith.addf %31, %33 : vector<16x32xf32>
    %c0_20 = arith.constant 0 : index
    %c0_21 = arith.constant 0 : index
    %35 = vector.load %arg9[%c0_20, %c0_21] : memref<16x32xf32, #tpu.memory_space<vmem>>, vector<16x32xf32>
    tpu.vector_store %arg9[%c0_20, %c0_21], %34 {strides = array<i32>} : memref<16x32xf32, #tpu.memory_space<vmem>>, vector<16x32xf32>,
    return
  }
  func.func @transform_0(%arg0: i32) -> (i32, i32) {
    %c0_i32 = arith.constant 0 : i32
    %c0_i32_0 = arith.constant 0 : i32
    return %arg0, %c0_i32 : i32, i32
  }
  func.func @transform_1(%arg0: i32) -> (i32, i32) {
    %c0_i32 = arith.constant 0 : i32
    %c0_i32_0 = arith.constant 0 : i32
    return %arg0, %c0_i32 : i32, i32
  }
  func.func @transform_2(%arg0: i32) -> (i32, i32) {
    %c0_i32 = arith.constant 0 : i32
    %c0_i32_0 = arith.constant 0 : i32
    return %arg0, %c0_i32 : i32, i32
  }
  func.func @transform_3(%arg0: i32) -> (i32, i32) {
    %c0_i32 = arith.constant 0 : i32
    %c0_i32_0 = arith.constant 0 : i32
    %c0_i32_1 = arith.constant 0 : i32
    return %c0_i32, %c0_i32_0 : i32, i32
  }
  func.func @transform_4(%arg0: i32) -> (i32, i32) {
    %c0_i32 = arith.constant 0 : i32
    %c0_i32_0 = arith.constant 0 : i32
    %c0_i32_1 = arith.constant 0 : i32
    return %c0_i32, %c0_i32_0 : i32, i32
  }
  func.func @transform_5(%arg0: i32) -> (i32, i32) {
    %c0_i32 = arith.constant 0 : i32
    %c0_i32_0 = arith.constant 0 : i32
    %c0_i32_1 = arith.constant 0 : i32
    return %c0_i32, %c0_i32_0 : i32, i32
  }
  func.func @transform_6(%arg0: i32) -> (i32, i32) {
    %c0_i32 = arith.constant 0 : i32
    %c0_i32_0 = arith.constant 0 : i32
    %c0_i32_1 = arith.constant 0 : i32
    return %c0_i32, %c0_i32_0 : i32, i32
  }
  func.func @transform_7(%arg0: i32) -> (i32, i32) {
    %c0_i32 = arith.constant 0 : i32
    %c0_i32_0 = arith.constant 0 : i32
    %c0_i32_1 = arith.constant 0 : i32
    return %c0_i32, %c0_i32_0 : i32, i32
  }
  func.func @transform_8(%arg0: i32) -> (i32, i32) {
    %c0_i32 = arith.constant 0 : i32
    %c0_i32_0 = arith.constant 0 : i32
    return %arg0, %c0_i32 : i32, i32
  }
}

</mosaic_0001>

<bundles_post_ra>
// kernel: tpu_custom_call.1
= control target key start
LH: loop header
LB: loop body
LE: loop exit
PB: predicated region body
PF: predicated region fallthrough
CT: control target
= control target key end

     0   :  { %13 = vsyncpa [#allocation3], 0  ;;  %s507_s0 = inlined_call_operand.hbm [shape: f32[16,32], index: 0, kind: input, shape index: {}]   ;;  %s508_s1 = inlined_call_operand.hbm [shape: f32[16,32], index: 1, kind: input, shape index: {}]   ;;  %s509_s2 = inlined_call_operand.hbm [shape: f32[16,32], index: 2, kind: input, shape index: {}]   ;;  %s510_s3 = inlined_call_operand.vmem [shape: f32[1,32], index: 3, kind: input, shape index: {}]   ;;  %s511_s4 = inlined_call_operand.vmem [shape: f32[1,32], index: 4, kind: input, shape index: {}]   ;;  %s512_s5 = inlined_call_operand.vmem [shape: f32[1,32], index: 5, kind: input, shape index: {}]   ;;  %s513_s6 = inlined_call_operand.hbm [shape: f32[32,32], index: 6, kind: input, shape index: {}]   ;;  %s514_s7 = inlined_call_operand.vmem [shape: f32[1,32], index: 7, kind: input, shape index: {}]   ;;  %s515_s8 = inlined_call_operand.hbm [shape: f32[16,32], index: 8, kind: output, shape index: {}]  }
   0x1   :  { %14 = vsyncpa [#allocation6], 0 }
   0x2   :  { %15 = vsyncpa [#allocation9], 0 }
   0x3   :  { %16 = vsyncpa [#allocation4], 0  ;;  %s405_s27 = smov [#allocation5]   ;;  %s406_s29 = smov [#allocation2]  }
   0x4   :  { %s34_s28 = sshll.u32 %s405_s27, 4  ;;  %s22_s30 = sshll.u32 %s406_s29, 4  ;;  %s35_s28 = int_to_ptr.vmem [resolvable:$true] %s34_s28  ;;  %s23_s30 = int_to_ptr.vmem [resolvable:$true] %s22_s30 }
   0x5   :  { %s305_s9 = scalar_lea.vmem %s35_s28, 256  ;;  %p310_p1 = scmp.lt.s32.totalorder %s35_s28, %s35_s28 }
   0x6   :  { %p306_p0 = scmp.ne.s32.totalorder %s35_s28, %s305_s9  ;;  %p311_p2 = scmp.lt.s32.totalorder %s305_s9, %s305_s9 }
   0x8   :  { %p312_p3 = por %p311_p2, %p310_p1 }
   0xa   :  { %p313_p4 = pnand %p312_p3, %p306_p0 }
   0xc   :  { %316 = shalt.err (!%p313_p4)
}
   0xd   :  { %s407_s10 = smov 128   ;;  %s408_s11 = smov 8  }
   0xe   :  { %40 = dma.hbm_to_vmem [thread:$0]  %s508_s1, 256, %s35_s28, [#allocation6], %s407_s10, %s407_s10, %s408_s11  }
   0xf   :  { %s325_s14 = scalar_lea.vmem %s23_s30, 256  ;;  %p330_p6 = scmp.lt.s32.totalorder %s23_s30, %s23_s30 }
  0x10   :  { %p326_p5 = scmp.ne.s32.totalorder %s23_s30, %s325_s14  ;;  %p331_p7 = scmp.lt.s32.totalorder %s325_s14, %s325_s14 }
  0x12   :  { %p332_p8 = por %p331_p7, %p330_p6 }
  0x14   :  { %p333_p9 = pnand %p332_p8, %p326_p5 }
  0x16   :  { %336 = shalt.err (!%p333_p9)
}
  0x17   :  { %28 = dma.hbm_to_vmem [thread:$0]  %s507_s0, 256, %s23_s30, [#allocation3], %s407_s10, %s407_s10, %s408_s11  }
  0x18   :  { %s409_s17 = smov [#allocation7]   ;;  %s410_s19 = smov [#allocation8]  }
  0x19   :  { %s46_s18 = sshll.u32 %s409_s17, 4  ;;  %s64_s20 = sshll.u32 %s410_s19, 4  ;;  %s47_s18 = int_to_ptr.vmem [resolvable:$true] %s46_s18  ;;  %s65_s20 = int_to_ptr.vmem [resolvable:$true] %s64_s20 }
  0x1a   :  { %s345_s1 = scalar_lea.vmem %s47_s18, 256  ;;  %p350_p11 = scmp.lt.s32.totalorder %s47_s18, %s47_s18 }
  0x1b   :  { %p346_p10 = scmp.ne.s32.totalorder %s47_s18, %s345_s1  ;;  %p351_p12 = scmp.lt.s32.totalorder %s345_s1, %s345_s1 }
  0x1d   :  { %p352_p13 = por %p351_p12, %p350_p11 }
  0x1f   :  { %p353_p0 = pnand %p352_p13, %p346_p10 }
  0x21   :  { %356 = shalt.err (!%p353_p0)
}
  0x22   :  { %52 = dma.hbm_to_vmem [thread:$0]  %s509_s2, 256, %s47_s18, [#allocation6], %s407_s10, %s407_s10, %s408_s11  }
  0x23   :  { %s365_s0 = scalar_lea.vmem %s65_s20, 512  ;;  %p370_p2 = scmp.lt.s32.totalorder %s65_s20, %s65_s20 }
  0x24   :  { %p366_p1 = scmp.ne.s32.totalorder %s65_s20, %s365_s0  ;;  %p371_p3 = scmp.lt.s32.totalorder %s365_s0, %s365_s0 }
  0x26   :  { %p372_p4 = por %p371_p3, %p370_p2 }
  0x28   :  { %p373_p5 = pnand %p372_p4, %p366_p1 }
  0x2a   :  { %376 = shalt.err (!%p373_p5)
}
  0x2b   :  { %70 = dma.hbm_to_vmem [thread:$0]  %s513_s6, 512, %s65_s20, [#allocation9], %s407_s10, %s407_s10, %s408_s11  }
  0x2c   :  { %397 = dma.done.wait [#allocation3], 256  }
  0x2d   :  { %398 = vsyncadd [#allocation3], 4294967040 }
  0x2e   :  { %399 = dma.done.wait [#allocation6], 512  }
  0x2f   :  { %400 = vsyncadd [#allocation6], 4294966784 }
  0x30   :  { %401 = dma.done.wait [#allocation9], 512  }
  0x31   :  { %402 = vsyncadd [#allocation9], 4294966784  ;;  %v85_v0 = vld [vmem:[#allocation2] sm:$0xff]  ;;  %v86_v4 = vld [vmem:[#allocation2 + $0x8] sm:$0xff]  ;;  %vm104_vm0 = vcmask 261120  }
  0x32   :  { %v263_v1 = vld [vmem:[%s510_s3] ss:$0 sm:$0xff]  ;;  %v97_v5 = vld [vmem:[#allocation7 + $0x8] sm:$0xff]  ;;  %v100_v6 = vld [vmem:[#allocation5] sm:$0xff] }
  0x33   :  { %v96_v2 = vld [vmem:[#allocation7] sm:$0xff]  ;;  %v94_v3 = vadd.f32 %v263_v1, %v85_v0  ;;  %v95_v7 = vadd.f32 %v263_v1, %v86_v4  ;;  %v101_v9 = vld [vmem:[#allocation5 + $0x8] sm:$0xff]  ;;  %v153_v25 = vld [vmem:[#allocation8 + $0x18] sm:$0xff] }
  0x34   :  { %v152_v26 = vld [vmem:[#allocation8 + $0x10] sm:$0xff]  ;;  %275 = vmatprep.subr.mxu0 %v153_v25  ;;  %v151_v27 = vld [vmem:[#allocation8 + $0x8] sm:$0xff]  ;;  %v150_v28 = vld [vmem:[#allocation8] sm:$0xff] }
  0x35   :  { %v98_v8 = vmul.f32 %v96_v2, %v94_v3  ;;  %v99_v10 = vmul.f32 %v97_v5, %v95_v7  ;;  %276 = vmatpush3.msra.mxu0 %v153_v25  ;;  %v264_v36 = vld [vmem:[%s511_s4] ss:$0 sm:$0xff]  ;;  %s411_s4 = smov [#allocation10]  }
  0x36   :  { %277 = vmatprep.subr.mxu0 %v152_v26  ;;  %v265_v38 = vld [vmem:[%s512_s5] ss:$0 sm:$0xff]  ;;  %s249_s30 = sshll.u32 %s411_s4, 4  ;;  %s250_s30 = int_to_ptr.vmem [resolvable:$true] %s249_s30 }
  0x37   :  { %v102_v11 = vadd.f32 %v100_v6, %v98_v8  ;;  %v103_v12 = vadd.f32 %v101_v9, %v99_v10  ;;  %278 = vmatpush3.msra.mxu0 %v152_v26  ;;  %v266_v45 = vld [vmem:[%s514_s7] ss:$0 sm:$0xff]  ;;  %s377_s5 = scalar_lea.vmem %s250_s30, 256  ;;  %p382_p7 = scmp.lt.s32.totalorder %s250_s30, %s250_s30 }
  0x38   :  { %279 = vmatprep.subr.mxu0 %v151_v27  ;;  %p378_p6 = scmp.ne.s32.totalorder %s250_s30, %s377_s5  ;;  %p383_p8 = scmp.lt.s32.totalorder %s377_s5, %s377_s5 }
  0x39   :  { %v105_v13 = vsel %vm104_vm0, %v102_v11, 0.0  ;;  %v108_v14 = vsel %vm104_vm0, %v103_v12, 0.0  ;;  %280 = vmatpush3.msra.mxu0 %v151_v27 }
  0x3a   :  { %106 = vadd.xlane.f32.xlu0 %v105_v13  ;;  %281 = vmatprep.subr.mxu0 %v150_v28  ;;  %p384_p9 = por %p383_p8, %p382_p7 }
  0x3b   :  { %282 = vmatpush3.msra.mxu0 %v150_v28 }
  0x3c   :  { %p385_p10 = pnand %p384_p9, %p378_p6 }
  0x3e   :  { %109 = vadd.xlane.f32.xlu0 %v108_v14 }
  0xc3   :  { %v107_v15 = vpop.xlane.xlu0 %106 }
  0xc4   :  { %v112_v16 = vmul.f32 0.03125, %v107_v15 }
  0xc6   :  { %v114_v17 = vsub.f32 %v102_v11, %v112_v16 }
  0xc7   :  { %v110_v18 = vpop.xlane.xlu0 %109 }
  0xc8   :  { %v113_v19 = vmul.f32 0.03125, %v110_v18  ;;  %v116_v20 = vmul.f32 %v114_v17, %v114_v17 }
  0xca   :  { %v115_v21 = vsub.f32 %v103_v12, %v113_v19  ;;  %v118_v22 = vsel %vm104_vm0, %v116_v20, 0.0 }
  0xcb   :  { %119 = vadd.xlane.f32.xlu1 %v118_v22 }
  0xcc   :  { %v117_v23 = vmul.f32 %v115_v21, %v115_v21 }
  0xce   :  { %v121_v24 = vsel %vm104_vm0, %v117_v23, 0.0 }
  0xcf   :  { %122 = vadd.xlane.f32.xlu1 %v121_v24 }
 0x154   :  { %v120_v29 = vpop.xlane.xlu1 %119 }
 0x155   :  { %v124_v30 = vmul.f32 0.03125, %v120_v29 }
 0x157   :  { %v126_v31 = vadd.f32 1e-12, %v124_v30 }
 0x158   :  { %v123_v32 = vpop.xlane.xlu1 %122 }
 0x159   :  { %293 = vrsqrt.f32 %v126_v31  ;;  %v125_v33 = vmul.f32 0.03125, %v123_v32 }
 0x15b   :  { %v127_v34 = vadd.f32 1e-12, %v125_v33 }
 0x15d   :  { %295 = vrsqrt.f32 %v127_v34 }
 0x166   :  { %v294_v35 = vpop.eup %293 }
 0x167   :  { %v130_v37 = vmul.f32 %v294_v35, %v114_v17 }
 0x169   :  { %v139_v39 = vmul.f32 %v264_v36, %v130_v37 }
 0x16a   :  { %v296_v40 = vpop.eup %295 }
 0x16b   :  { %v131_v41 = vmul.f32 %v296_v40, %v115_v21  ;;  %v148_v42 = vadd.f32 %v265_v38, %v139_v39 }
 0x16d   :  { %v140_v43 = vmul.f32 %v264_v36, %v131_v41  ;;  %283 = vmatprep.mubr.msk.f32.mxu0 %vm104_vm0, %v148_v42 }
 0x16f   :  { %v149_v44 = vadd.f32 %v265_v38, %v140_v43 }
 0x171   :  { %284 = vmatmul.mubr.msk.f32.vlgmr.msra.gmra.mxu0 %vm104_vm0, %v149_v44 }
 0x231   :  { %v285_v46 = vpop.f32.mrf.mxu0 }
 0x232   :  { %v239_v47 = vadd.f32 %v285_v46, %v266_v45 }
 0x233   :  { %v233_v48 = vpop.f32.mrf.mxu0 }
 0x234   :  { %243 = vst.msk [vmem:[#allocation10 + $0x8] sm:$0xff] %vm104_vm0, %v239_v47  ;;  %v234_v49 = vadd.f32 %v266_v45, %v233_v48 }
 0x236   :  { %242 = vst.msk [vmem:[#allocation10] sm:$0xff] %vm104_vm0, %v234_v49 }
 0x237   :  { %388 = shalt.err (!%p385_p10)
}
 0x238   :  { %255 = dma.vmem_to_hbm [thread:$0]  %s250_s30, 256, %s515_s8, [#allocation4], %s407_s10, %s407_s10, %s408_s11  }
 0x239   :  { %403 = dma.done.wait [#allocation4], 256  }
 0x23a   :  { %404 = vsyncadd [#allocation4], 4294967040 }
 0x23b   :  { %259 = vsyncpa [#allocation3], 1 }
 0x23c   :  { %260 = vsyncpa [#allocation6], 1 }
 0x23d   :  { %261 = vsyncpa [#allocation9], 1 }
 0x23e   :  { %262 = vsyncpa [#allocation4], 1 }

</bundles_post_ra>
